<compile_context>
chip_gen: v7x
topology: tpu7x:2x2x1
jax: 0.10.0
libtpu: 0.0.40
codegen_flags: <defaults>
</compile_context>

<pallas_src>
import jax
import jax.numpy as jnp
from jax.experimental import pallas as pl
from jax.experimental.pallas import tpu as pltpu

STATE_SIZE = 8
ACTION_SIZE = 4
HIDDEN_SIZE = 64
HIDDEN_PAD = 128      # hidden width padded to a full 128-lane vreg
DEFAULT_TB = 512      # batch tile (multiple of 8); safe on v5e/v6e/v7x VMEM


def _round_up(n, m):
    return (n + m - 1) // m * m


def dqn_kernel(x_ref, w1_ref, b1_ref, w2_ref, b2_ref, w3_ref, b3_ref, out_ref):
    # x/weights are bf16, accumulation is f32 on the MXU.
    x = x_ref[...]                                                       # [TB, S] bf16
    h1 = jnp.dot(x, w1_ref[...], preferred_element_type=jnp.float32) + b1_ref[...]
    h1 = jnp.maximum(h1, 0.0).astype(jnp.bfloat16)                       # [TB, 128]
    h2 = jnp.dot(h1, w2_ref[...], preferred_element_type=jnp.float32) + b2_ref[...]
    h2 = jnp.maximum(h2, 0.0).astype(jnp.bfloat16)                       # [TB, 128]
    q = jnp.dot(h2, w3_ref[...], preferred_element_type=jnp.float32) + b3_ref[...]
    out_ref[...] = q.astype(out_ref.dtype)                               # [TB, A]


def dqn_forward(x, params, tb=DEFAULT_TB):
    """x: [B, state_size] float32 -> [B, action_size] float32."""
    w1, b1, w2, b2, w3, b3 = params
    B = x.shape[0]

    # Batch tile: multiple of 8 (sublane alignment), capped at `tb`.
    TB = min(tb, _round_up(B, 8))
    B_pad = _round_up(B, TB)
    if B_pad != B:
        x = jnp.pad(x, ((0, B_pad - B), (0, 0)))
    x = x.astype(jnp.bfloat16)

    grid = (B_pad // TB,)
    resident = lambda i: (0, 0)   # weights/biases stay in VMEM across all steps

    weight_bytes = ((STATE_SIZE + HIDDEN_PAD) * HIDDEN_PAD * 2
                    + HIDDEN_PAD * ACTION_SIZE * 2
                    + (2 * HIDDEN_PAD + ACTION_SIZE) * 4)
    cost = pl.CostEstimate(
        flops=2 * B_pad * (STATE_SIZE * HIDDEN_PAD
                           + HIDDEN_PAD * HIDDEN_PAD
                           + HIDDEN_PAD * ACTION_SIZE),
        transcendentals=0,
        bytes_accessed=B_pad * STATE_SIZE * 2 + B_pad * ACTION_SIZE * 4 + weight_bytes,
    )

    out = pl.pallas_call(
        dqn_kernel,
        out_shape=jax.ShapeDtypeStruct((B_pad, ACTION_SIZE), jnp.float32),
        grid=grid,
        in_specs=[
            pl.BlockSpec((TB, STATE_SIZE), lambda i: (i, 0)),        # x (streamed)
            pl.BlockSpec((STATE_SIZE, HIDDEN_PAD), resident),        # w1
            pl.BlockSpec((1, HIDDEN_PAD), resident),                 # b1
            pl.BlockSpec((HIDDEN_PAD, HIDDEN_PAD), resident),        # w2
            pl.BlockSpec((1, HIDDEN_PAD), resident),                 # b2
            pl.BlockSpec((HIDDEN_PAD, ACTION_SIZE), resident),       # w3
            pl.BlockSpec((1, ACTION_SIZE), resident),                # b3
        ],
        out_specs=pl.BlockSpec((TB, ACTION_SIZE), lambda i: (i, 0)),
        compiler_params=pltpu.CompilerParams(
            dimension_semantics=("parallel",)),
        cost_estimate=cost,
    )(x, w1, b1, w2, b2, w3, b3)
    return out[:B]


def init_params(key):
    """Deterministic init mimicking torch.nn.Linear (uniform +/- 1/sqrt(fan_in)),
    then zero-padded to the 128-wide hidden layout and cast to bf16 weights."""
    def linear(key, fan_in, fan_out):
        kw, kb = jax.random.split(key)
        bound = 1.0 / jnp.sqrt(fan_in)
        w = jax.random.uniform(kw, (fan_in, fan_out), jnp.float32, -bound, bound)
        b = jax.random.uniform(kb, (1, fan_out), jnp.float32, -bound, bound)
        return w, b

    k1, k2, k3 = jax.random.split(key, 3)
    w1, b1 = linear(k1, STATE_SIZE, HIDDEN_SIZE)
    w2, b2 = linear(k2, HIDDEN_SIZE, HIDDEN_SIZE)
    w3, b3 = linear(k3, HIDDEN_SIZE, ACTION_SIZE)

    # Zero-pad hidden 64 -> 128.  Padded units have zero weight + zero bias, so
    # they output relu(0)=0 and do not change the network function.
    w1p = jnp.zeros((STATE_SIZE, HIDDEN_PAD), jnp.float32).at[:, :HIDDEN_SIZE].set(w1)
    b1p = jnp.zeros((1, HIDDEN_PAD), jnp.float32).at[:, :HIDDEN_SIZE].set(b1)
    w2p = jnp.zeros((HIDDEN_PAD, HIDDEN_PAD), jnp.float32).at[:HIDDEN_SIZE, :HIDDEN_SIZE].set(w2)
    b2p = jnp.zeros((1, HIDDEN_PAD), jnp.float32).at[:, :HIDDEN_SIZE].set(b2)
    w3p = jnp.zeros((HIDDEN_PAD, ACTION_SIZE), jnp.float32).at[:HIDDEN_SIZE, :].set(w3)

    return (w1p.astype(jnp.bfloat16), b1p,
            w2p.astype(jnp.bfloat16), b2p,
            w3p.astype(jnp.bfloat16), b3)


def dqn_reference(x, params):
    """Pure-JAX reference that mirrors the kernel's bf16-in / f32-acc numerics."""
    w1, b1, w2, b2, w3, b3 = params
    x = x.astype(jnp.bfloat16)
    h1 = jnp.maximum(jnp.dot(x, w1, preferred_element_type=jnp.float32) + b1, 0.0)
    h1 = h1.astype(jnp.bfloat16)
    h2 = jnp.maximum(jnp.dot(h1, w2, preferred_element_type=jnp.float32) + b2, 0.0)
    h2 = h2.astype(jnp.bfloat16)
    return jnp.dot(h2, w3, preferred_element_type=jnp.float32) + b3


if __name__ == "__main__":
    key = jax.random.PRNGKey(0)
    kp, kx1, kx2 = jax.random.split(key, 3)
    params = init_params(kp)

    # Small, TB-aligned batch.
    batch = 8
    x = jax.random.normal(kx1, (batch, STATE_SIZE), jnp.float32)
    out = dqn_forward(x, params)
    jax.block_until_ready(out)
    ref = dqn_reference(x, params)
    assert out.shape == (batch, ACTION_SIZE)
    assert jnp.allclose(out, ref, atol=1e-2, rtol=1e-2)

    # Ragged batch (exercises the pad-to-tile + slice-back path).
    batch2 = 20
    x2 = jax.random.normal(kx2, (batch2, STATE_SIZE), jnp.float32)
    out2 = dqn_forward(x2, params)
    jax.block_until_ready(out2)
    ref2 = dqn_reference(x2, params)
    assert out2.shape == (batch2, ACTION_SIZE)
    assert jnp.allclose(out2, ref2, atol=1e-2, rtol=1e-2)

    print("KERNEL_OK")
</pallas_src>

<mosaic_0001>
module attributes {stable_mosaic.version = 11 : i64} {
  func.func @dqn_kernel(%arg0: i32, %arg1: memref<8x8xbf16, #tpu.memory_space<vmem>>, %arg2: memref<8x128xbf16, #tpu.memory_space<vmem>>, %arg3: memref<1x128xf32, #tpu.memory_space<vmem>>, %arg4: memref<128x128xbf16, #tpu.memory_space<vmem>>, %arg5: memref<1x128xf32, #tpu.memory_space<vmem>>, %arg6: memref<128x4xbf16, #tpu.memory_space<vmem>>, %arg7: memref<1x4xf32, #tpu.memory_space<vmem>>, %arg8: memref<8x4xf32, #tpu.memory_space<vmem>>) attributes {dimension_semantics = [#tpu.dimension_semantics<parallel>], iteration_bounds = array<i64: 1>, scalar_prefetch = 0 : i64, scratch_operands = 0 : i64, tpu.core_type = #tpu.core_type<tc>, window_params = [{transform_indices = @transform_0, window_bounds = array<i64: 8, 8>}, {pipeline_mode = #tpu.pipeline_mode<synchronous>, transform_indices = @transform_1, window_bounds = array<i64: 8, 128>}, {pipeline_mode = #tpu.pipeline_mode<synchronous>, transform_indices = @transform_2, window_bounds = array<i64: 1, 128>}, {pipeline_mode = #tpu.pipeline_mode<synchronous>, transform_indices = @transform_3, window_bounds = array<i64: 128, 128>}, {pipeline_mode = #tpu.pipeline_mode<synchronous>, transform_indices = @transform_4, window_bounds = array<i64: 1, 128>}, {pipeline_mode = #tpu.pipeline_mode<synchronous>, transform_indices = @transform_5, window_bounds = array<i64: 128, 4>}, {pipeline_mode = #tpu.pipeline_mode<synchronous>, transform_indices = @transform_6, window_bounds = array<i64: 1, 4>}, {transform_indices = @transform_7, window_bounds = array<i64: 8, 4>}]} {
    %c0 = arith.constant 0 : index
    %c0_0 = arith.constant 0 : index
    %0 = vector.load %arg1[%c0, %c0_0] : memref<8x8xbf16, #tpu.memory_space<vmem>>, vector<8x8xbf16>
    %c0_1 = arith.constant 0 : index
    %c0_2 = arith.constant 0 : index
    %1 = vector.load %arg2[%c0_1, %c0_2] : memref<8x128xbf16, #tpu.memory_space<vmem>>, vector<8x128xbf16>
    %cst = arith.constant dense<0.000000e+00> : vector<8x128xf32>
    %2 = tpu.matmul %0, %1, %cst {dimension_numbers = #tpu.dot_dimension_numbers<[1], [0], [0], [1], [0, 0, 1, 1], [], []>} : vector<8x8xbf16>, vector<8x128xbf16>, vector<8x128xf32> -> vector<8x128xf32>
    %c0_3 = arith.constant 0 : index
    %c0_4 = arith.constant 0 : index
    %3 = vector.load %arg3[%c0_3, %c0_4] : memref<1x128xf32, #tpu.memory_space<vmem>>, vector<1x128xf32>
    %4 = vector.broadcast %3 : vector<1x128xf32> to vector<8x128xf32>
    %5 = arith.addf %2, %4 : vector<8x128xf32>
    %cst_5 = arith.constant 0.000000e+00 : f32
    %6 = vector.broadcast %cst_5 : f32 to vector<8x128xf32>
    %7 = arith.maximumf %5, %6 : vector<8x128xf32>
    %8 = arith.truncf %7 : vector<8x128xf32> to vector<8x128xbf16>
    %c0_6 = arith.constant 0 : index
    %c0_7 = arith.constant 0 : index
    %9 = vector.load %arg4[%c0_6, %c0_7] : memref<128x128xbf16, #tpu.memory_space<vmem>>, vector<128x128xbf16>
    %cst_8 = arith.constant dense<0.000000e+00> : vector<8x128xf32>
    %10 = tpu.matmul %8, %9, %cst_8 {dimension_numbers = #tpu.dot_dimension_numbers<[1], [0], [0], [1], [0, 0, 1, 1], [], []>} : vector<8x128xbf16>, vector<128x128xbf16>, vector<8x128xf32> -> vector<8x128xf32>
    %c0_9 = arith.constant 0 : index
    %c0_10 = arith.constant 0 : index
    %11 = vector.load %arg5[%c0_9, %c0_10] : memref<1x128xf32, #tpu.memory_space<vmem>>, vector<1x128xf32>
    %12 = vector.broadcast %11 : vector<1x128xf32> to vector<8x128xf32>
    %13 = arith.addf %10, %12 : vector<8x128xf32>
    %cst_11 = arith.constant 0.000000e+00 : f32
    %14 = vector.broadcast %cst_11 : f32 to vector<8x128xf32>
    %15 = arith.maximumf %13, %14 : vector<8x128xf32>
    %16 = arith.truncf %15 : vector<8x128xf32> to vector<8x128xbf16>
    %c0_12 = arith.constant 0 : index
    %c0_13 = arith.constant 0 : index
    %17 = vector.load %arg6[%c0_12, %c0_13] : memref<128x4xbf16, #tpu.memory_space<vmem>>, vector<128x4xbf16>
    %cst_14 = arith.constant dense<0.000000e+00> : vector<8x4xf32>
    %18 = tpu.matmul %16, %17, %cst_14 {dimension_numbers = #tpu.dot_dimension_numbers<[1], [0], [0], [1], [0, 0, 1, 1], [], []>} : vector<8x128xbf16>, vector<128x4xbf16>, vector<8x4xf32> -> vector<8x4xf32>
    %c0_15 = arith.constant 0 : index
    %c0_16 = arith.constant 0 : index
    %19 = vector.load %arg7[%c0_15, %c0_16] : memref<1x4xf32, #tpu.memory_space<vmem>>, vector<1x4xf32>
    %20 = vector.broadcast %19 : vector<1x4xf32> to vector<8x4xf32>
    %21 = arith.addf %18, %20 : vector<8x4xf32>
    %c0_17 = arith.constant 0 : index
    %c0_18 = arith.constant 0 : index
    %22 = vector.load %arg8[%c0_17, %c0_18] : memref<8x4xf32, #tpu.memory_space<vmem>>, vector<8x4xf32>
    tpu.vector_store %arg8[%c0_17, %c0_18], %21 {strides = array<i32>} : memref<8x4xf32, #tpu.memory_space<vmem>>, vector<8x4xf32>,
    return
  }
  func.func @transform_0(%arg0: i32) -> (i32, i32) {
    %c0_i32 = arith.constant 0 : i32
    %c0_i32_0 = arith.constant 0 : i32
    return %arg0, %c0_i32 : i32, i32
  }
  func.func @transform_1(%arg0: i32) -> (i32, i32) {
    %c0_i32 = arith.constant 0 : i32
    %c0_i32_0 = arith.constant 0 : i32
    %c0_i32_1 = arith.constant 0 : i32
    return %c0_i32, %c0_i32_0 : i32, i32
  }
  func.func @transform_2(%arg0: i32) -> (i32, i32) {
    %c0_i32 = arith.constant 0 : i32
    %c0_i32_0 = arith.constant 0 : i32
    %c0_i32_1 = arith.constant 0 : i32
    return %c0_i32, %c0_i32_0 : i32, i32
  }
  func.func @transform_3(%arg0: i32) -> (i32, i32) {
    %c0_i32 = arith.constant 0 : i32
    %c0_i32_0 = arith.constant 0 : i32
    %c0_i32_1 = arith.constant 0 : i32
    return %c0_i32, %c0_i32_0 : i32, i32
  }
  func.func @transform_4(%arg0: i32) -> (i32, i32) {
    %c0_i32 = arith.constant 0 : i32
    %c0_i32_0 = arith.constant 0 : i32
    %c0_i32_1 = arith.constant 0 : i32
    return %c0_i32, %c0_i32_0 : i32, i32
  }
  func.func @transform_5(%arg0: i32) -> (i32, i32) {
    %c0_i32 = arith.constant 0 : i32
    %c0_i32_0 = arith.constant 0 : i32
    %c0_i32_1 = arith.constant 0 : i32
    return %c0_i32, %c0_i32_0 : i32, i32
  }
  func.func @transform_6(%arg0: i32) -> (i32, i32) {
    %c0_i32 = arith.constant 0 : i32
    %c0_i32_0 = arith.constant 0 : i32
    %c0_i32_1 = arith.constant 0 : i32
    return %c0_i32, %c0_i32_0 : i32, i32
  }
  func.func @transform_7(%arg0: i32) -> (i32, i32) {
    %c0_i32 = arith.constant 0 : i32
    %c0_i32_0 = arith.constant 0 : i32
    return %arg0, %c0_i32 : i32, i32
  }
}

</mosaic_0001>

<bundles_post_ra>
// kernel: tpu_custom_call.1
= control target key start
LH: loop header
LB: loop body
LE: loop exit
PB: predicated region body
PF: predicated region fallthrough
CT: control target
= control target key end

     0   :  { %vm40_vm0 = vcmask 1043456   ;;  %v420_v0 = vmov 0.0   ;;  %vm421_vm1 = vmmov 0   ;;  %vm36_vm2 = vcmask 64512   ;;  %s548_s1 = inlined_call_operand.vmem [shape: bf16[8,128], index: 1, kind: input, shape index: {}]   ;;  %s549_s0 = inlined_call_operand.vmem [shape: bf16[8,8], index: 0, kind: input, shape index: {}]   ;;  %s550_s3 = inlined_call_operand.vmem [shape: bf16[128,128], index: 3, kind: input, shape index: {}]   ;;  %s551_s5 = inlined_call_operand.vmem [shape: bf16[128,4], index: 5, kind: input, shape index: {}]   ;;  %s552_s2 = inlined_call_operand.vmem [shape: f32[1,128], index: 2, kind: input, shape index: {}]   ;;  %s553_s4 = inlined_call_operand.vmem [shape: f32[1,128], index: 4, kind: input, shape index: {}]   ;;  %s554_s6 = inlined_call_operand.vmem [shape: f32[1,4], index: 6, kind: input, shape index: {}]   ;;  %s555_s7 = inlined_call_operand.vmem [shape: f32[8,4], index: 7, kind: output, shape index: {}]  }
   0x1   :  { %356 = vmatprep.subr.bf16.mxu0 %v420_v0  ;;  %v28_v1 = vld [vmem:[%s548_s1] sm:$0xf]  ;;  %358 = vmatprep.mubr.msk.bf16.mxu0 %vm421_vm1, %v420_v0  ;;  %v405_v5 = vld [vmem:[%s550_s3 + $0x8] sm:$0xff]   ;;  %v406_v6 = vld [vmem:[%s550_s3 + $0x10] sm:$0xff]   ;;  %vm310_vm3 = vcmask 31744  }
   0x2   :  { %v42_v2 = vsel %vm40_vm0, %v28_v1, 0  ;;  %362 = vmatprep.subr.bf16.mxu1 %v420_v0  ;;  %v404_v3 = vld [vmem:[%s550_s3] sm:$0xff]   ;;  %378 = vmatprep.mubr.msk.bf16.mxu1 %vm421_vm1, %v420_v0  ;;  %v407_v7 = vld [vmem:[%s550_s3 + $0x18] sm:$0xff]   ;;  %v409_v9 = vld [vmem:[%s550_s3 + $0x28] sm:$0xff]  }
   0x3   :  { %357 = vmatpush3.bf16.msra.mxu0 %v42_v2  ;;  %v27_v4 = vld [vmem:[%s549_s0] sm:$0xf]  ;;  %363 = vmatpush3.bf16.msra.mxu1 %v404_v3  ;;  %v410_v10 = vld [vmem:[%s550_s3 + $0x30] sm:$0xff]   ;;  %v411_v11 = vld [vmem:[%s550_s3 + $0x38] sm:$0xff]  }
   0x4   :  { %382 = vmatprep.subr.bf16.mxu0 %v420_v0  ;;  %364 = vmatprep.subr.bf16.mxu1 %v420_v0  ;;  %v408_v8 = vld [vmem:[%s550_s3 + $0x20] sm:$0xff]   ;;  %v413_v13 = vld [vmem:[%s551_s5 + $0x8] sm:$0xff]   ;;  %v414_v14 = vld [vmem:[%s551_s5 + $0x10] sm:$0xff]  }
   0x5   :  { %v412_v12 = vld [vmem:[%s551_s5] sm:$0xff]   ;;  %v415_v15 = vld [vmem:[%s551_s5 + $0x18] sm:$0xff]   ;;  %v417_v17 = vld [vmem:[%s551_s5 + $0x28] sm:$0xff]  }
   0x6   :  { %359 = vmatmul.mubr.msk.bf16.vlgmr.msra.gmra.mrb[0].mxu0 %vm36_vm2, %v27_v4  ;;  %v416_v16 = vld [vmem:[%s551_s5 + $0x20] sm:$0xff]   ;;  %v418_v26 = vld [vmem:[%s551_s5 + $0x30] sm:$0xff]   ;;  %v419_v27 = vld [vmem:[%s551_s5 + $0x38] sm:$0xff]  }
   0x7   :  { %398 = vmatprep.mubr.msk.bf16.mxu0 %vm421_vm1, %v420_v0  ;;  %365 = vmatpush3.bf16.msra.mxu1 %v405_v5  ;;  %v316_v18 = vld [vmem:[%s552_s2] ss:$0 sm:$0xff] }
   0x8   :  { %366 = vmatprep.subr.bf16.mxu1 %v420_v0  ;;  %383 = vmatpush3.bf16.msra.mxu0 %v412_v12  ;;  %v318_v28 = vld [vmem:[%s553_s4] ss:$0 sm:$0xff] }
   0x9   :  { %384 = vmatprep.subr.bf16.mxu0 %v420_v0  ;;  %v327_v36 = vld [vmem:[%s554_s6] ss:$0 sm:$0xff] }
   0xb   :  { %367 = vmatpush3.bf16.msra.mxu1 %v406_v6 }
   0xc   :  { %368 = vmatprep.subr.bf16.mxu1 %v420_v0  ;;  %385 = vmatpush3.bf16.msra.mxu0 %v413_v13 }
   0xd   :  { %386 = vmatprep.subr.bf16.mxu0 %v420_v0 }
   0xf   :  { %369 = vmatpush3.bf16.msra.mxu1 %v407_v7 }
  0x10   :  { %370 = vmatprep.subr.bf16.mxu1 %v420_v0  ;;  %387 = vmatpush3.bf16.msra.mxu0 %v414_v14 }
  0x11   :  { %388 = vmatprep.subr.bf16.mxu0 %v420_v0 }
  0x13   :  { %371 = vmatpush3.bf16.msra.mxu1 %v408_v8 }
  0x14   :  { %372 = vmatprep.subr.bf16.mxu1 %v420_v0  ;;  %389 = vmatpush3.bf16.msra.mxu0 %v415_v15 }
  0x15   :  { %390 = vmatprep.subr.bf16.mxu0 %v420_v0 }
  0x17   :  { %373 = vmatpush3.bf16.msra.mxu1 %v409_v9 }
  0x18   :  { %374 = vmatprep.subr.bf16.mxu1 %v420_v0  ;;  %391 = vmatpush3.bf16.msra.mxu0 %v416_v16 }
  0x19   :  { %392 = vmatprep.subr.bf16.mxu0 %v420_v0 }
  0x1b   :  { %375 = vmatpush3.bf16.msra.mxu1 %v410_v10 }
  0x1c   :  { %376 = vmatprep.subr.bf16.mxu1 %v420_v0  ;;  %393 = vmatpush3.bf16.msra.mxu0 %v417_v17 }
  0x1d   :  { %394 = vmatprep.subr.bf16.mxu0 %v420_v0 }
  0x1f   :  { %377 = vmatpush3.bf16.msra.mxu1 %v411_v11 }
  0x20   :  { %395 = vmatpush3.bf16.msra.mxu0 %v418_v26 }
  0x21   :  { %396 = vmatprep.subr.bf16.mxu0 %v420_v0 }
  0x24   :  { %397 = vmatpush3.bf16.msra.mxu0 %v419_v27 }
  0xd9   :  { %v78_v19 = vpop.f32.mrb[0].mxu0 }
  0xda   :  { %v79_v20 = vadd.f32 %v316_v18, %v78_v19  ;;  %v360_v21 = vpop.f32.mrb[1].mxu0 }
  0xdb   :  { %v81_v22 = vpop.f32.mrb[2].mxu0 }
  0xdc   :  { %v84_v23 = vmax.f32 %v79_v20, 0.0  ;;  %v361_v24 = vpop.f32.mrb[3].mxu0 }
  0xde   :  { %v85_v25 = vpack.c.bf16 %v84_v23, %v84_v23 }
  0xe0   :  { %379 = vmatmul.mubr.bf16.vlgmr.msra.gmra.mrb[0].mxu1 %v85_v25 }
 0x1b3   :  { %v191_v29 = vpop.f32.mrb[0].mxu1 }
 0x1b4   :  { %v192_v30 = vadd.f32 %v318_v28, %v191_v29  ;;  %v380_v31 = vpop.f32.mrb[1].mxu1 }
 0x1b5   :  { %v194_v32 = vpop.f32.mrb[2].mxu1 }
 0x1b6   :  { %v197_v33 = vmax.f32 %v192_v30, 0.0  ;;  %v381_v34 = vpop.f32.mrb[3].mxu1 }
 0x1b8   :  { %v198_v35 = vpack.c.bf16 %v197_v33, %v197_v33 }
 0x1ba   :  { %399 = vmatmul.mubr.bf16.vlgmr.msra.gmra.mrb[4].mxu0 %v198_v35 }
 0x28d   :  { %v304_v37 = vpop.f32.mrb[4].mxu0 }
 0x28e   :  { %v305_v38 = vadd.f32 %v327_v36, %v304_v37  ;;  %v400_v39 = vpop.f32.mrb[5].mxu0 }
 0x28f   :  { %v307_v40 = vpop.f32.mrb[6].mxu0 }
 0x290   :  { %311 = vst.msk [vmem:[%s555_s7] sm:$0xff] %vm310_vm3, %v305_v38  ;;  %v401_v41 = vpop.f32.mrb[7].mxu0 }

</bundles_post_ra>
